<compile_context>
chip_gen: v7x
topology: tpu7x:2x2x1
jax: 0.10.0
libtpu: 0.0.40
codegen_flags: <defaults>
</compile_context>

<pallas_src>
import jax
import jax.numpy as jnp
from jax.experimental import pallas as pl
from jax.experimental.pallas import tpu as pltpu


IN_FEATURES = 50 * 50 * 1      # 2500
HIDDEN = 120
OUT_FEATURES = 1

IN_F_PAD = 2560                # next multiple of 128 >= 2500
HIDDEN_PAD = 128               # next multiple of 128 >= 120


def _round_up(n, m):
    return ((n + m - 1) // m) * m


def _mlp_kernel(x_ref, w1_ref, b1_ref, w2r_ref, b2_ref, o_ref):
    # fc1 on the MXU: (TILE_B, 2560) @ (2560, 128), f32 accumulation.
    h = jnp.dot(x_ref[...], w1_ref[...], preferred_element_type=jnp.float32)
    # bias + ReLU on the VPU.
    h = jnp.maximum(h + b1_ref[...], 0.0)
    # fc2 as VPU multiply + cross-lane (XLU) reduction: keeps the MXU free.
    # Padded hidden lanes of h and w2r are zero, so they contribute nothing.
    y = jnp.sum(h * w2r_ref[...], axis=-1, keepdims=True) + b2_ref[...]
    o_ref[...] = y.astype(o_ref.dtype)


def calvis_mlp_forward(x, w1, b1, w2, b2, *, tile_b=512):
    """x: (B, 1, 50, 50) float32 NCHW.  w1: (2500, 120), b1: (120,),
    w2: (120, 1), b2: (1,).  Returns (B, 1) float32."""
    B = x.shape[0]
    x_flat = x.reshape(B, -1).astype(jnp.float32)   # same as torch .view(-1, 2500)
    assert x_flat.shape[1] == IN_FEATURES

    # Batch tile: at most `tile_b` rows, at least 8 (sublane), multiple of 8.
    tile_b = max(8, min(_round_up(tile_b, 8), _round_up(B, 8)))
    b_pad = _round_up(B, tile_b)

    # Zero-pad to lane-aligned shapes (numerically a no-op).
    x_p = jnp.pad(x_flat, ((0, b_pad - B), (0, IN_F_PAD - IN_FEATURES)))
    w1_p = jnp.pad(w1.astype(jnp.float32),
                   ((0, IN_F_PAD - IN_FEATURES), (0, HIDDEN_PAD - HIDDEN)))
    b1_p = jnp.pad(b1.astype(jnp.float32).reshape(1, HIDDEN),
                   ((0, 0), (0, HIDDEN_PAD - HIDDEN)))
    w2_row = jnp.pad(w2.astype(jnp.float32).reshape(1, HIDDEN),
                     ((0, 0), (0, HIDDEN_PAD - HIDDEN)))
    b2_2d = b2.astype(jnp.float32).reshape(1, OUT_FEATURES)

    grid = (b_pad // tile_b,)

    out = pl.pallas_call(
        _mlp_kernel,
        out_shape=jax.ShapeDtypeStruct((b_pad, OUT_FEATURES), jnp.float32),
        grid_spec=pltpu.PrefetchScalarGridSpec(
            num_scalar_prefetch=0,
            grid=grid,
            in_specs=[
                # x: streamed / double-buffered over the batch grid axis.
                pl.BlockSpec((tile_b, IN_F_PAD), lambda i: (i, 0)),
                # Weights & biases: constant index_map -> resident in VMEM.
                pl.BlockSpec((IN_F_PAD, HIDDEN_PAD), lambda i: (0, 0)),
                pl.BlockSpec((1, HIDDEN_PAD), lambda i: (0, 0)),
                pl.BlockSpec((1, HIDDEN_PAD), lambda i: (0, 0)),
                pl.BlockSpec((1, OUT_FEATURES), lambda i: (0, 0)),
            ],
            out_specs=pl.BlockSpec((tile_b, OUT_FEATURES), lambda i: (i, 0)),
        ),
        compiler_params=pltpu.CompilerParams(
            # Batch tiles are independent -> v7x can shard them across its 2 TCs.
            dimension_semantics=("parallel",),
            # ~13 MiB needed at tile_b=512 (2 x-buffers + resident W1); 48 MiB
            # leaves headroom up to tile_b~2048 while staying under v7x's 64 MiB.
            vmem_limit_bytes=48 * 1024 * 1024,
        ),
    )(x_p, w1_p, b1_p, w2_row, b2_2d)

    return out[:B]


def init_params(key):
    """Deterministic init mimicking nn.Linear defaults (U(-1/sqrt(fan_in), +))."""
    k1, k2, k3, k4 = jax.random.split(key, 4)
    bound1 = 1.0 / jnp.sqrt(jnp.float32(IN_FEATURES))
    bound2 = 1.0 / jnp.sqrt(jnp.float32(HIDDEN))
    # Stored already transposed relative to nn.Linear's (out, in) layout.
    w1 = jax.random.uniform(k1, (IN_FEATURES, HIDDEN), jnp.float32, -bound1, bound1)
    b1 = jax.random.uniform(k2, (HIDDEN,), jnp.float32, -bound1, bound1)
    w2 = jax.random.uniform(k3, (HIDDEN, OUT_FEATURES), jnp.float32, -bound2, bound2)
    b2 = jax.random.uniform(k4, (OUT_FEATURES,), jnp.float32, -bound2, bound2)
    return w1, b1, w2, b2


if __name__ == "__main__":
    key = jax.random.PRNGKey(0)
    k_x, k_p = jax.random.split(key)

    # Small batch, NCHW like PyTorch: (B, C=1, H=50, W=50)
    B = 2
    x = jax.random.normal(k_x, (B, 1, 50, 50), jnp.float32)
    w1, b1, w2, b2 = init_params(k_p)

    out = calvis_mlp_forward(x, w1, b1, w2, b2)
    out = jax.block_until_ready(out)

    # Cross-check against plain-JAX reference of the same (unpadded) math.
    ref = jnp.maximum(x.reshape(B, -1) @ w1 + b1, 0.0) @ w2 + b2
    assert out.shape == (B, 1)
    assert jnp.allclose(out, ref, atol=1e-4, rtol=1e-4)

    print("KERNEL_OK")
</pallas_src>

<mosaic_0001>
module attributes {stable_mosaic.version = 11 : i64} {
  func.func @_mlp_kernel(%arg0: i32, %arg1: memref<8x2560xf32, #tpu.memory_space<vmem>>, %arg2: memref<2560x128xf32, #tpu.memory_space<vmem>>, %arg3: memref<1x128xf32, #tpu.memory_space<vmem>>, %arg4: memref<1x128xf32, #tpu.memory_space<vmem>>, %arg5: memref<1x1xf32, #tpu.memory_space<vmem>>, %arg6: memref<8x1xf32, #tpu.memory_space<vmem>>) attributes {dimension_semantics = [#tpu.dimension_semantics<parallel>], iteration_bounds = array<i64: 1>, scalar_prefetch = 0 : i64, scratch_operands = 0 : i64, tpu.core_type = #tpu.core_type<tc>, window_params = [{transform_indices = @transform_0, window_bounds = array<i64: 8, 2560>}, {pipeline_mode = #tpu.pipeline_mode<synchronous>, transform_indices = @transform_1, window_bounds = array<i64: 2560, 128>}, {pipeline_mode = #tpu.pipeline_mode<synchronous>, transform_indices = @transform_2, window_bounds = array<i64: 1, 128>}, {pipeline_mode = #tpu.pipeline_mode<synchronous>, transform_indices = @transform_3, window_bounds = array<i64: 1, 128>}, {pipeline_mode = #tpu.pipeline_mode<synchronous>, transform_indices = @transform_4, window_bounds = array<i64: 1, 1>}, {transform_indices = @transform_5, window_bounds = array<i64: 8, 1>}]} {
    %c0 = arith.constant 0 : index
    %c0_0 = arith.constant 0 : index
    %0 = vector.load %arg1[%c0, %c0_0] : memref<8x2560xf32, #tpu.memory_space<vmem>>, vector<8x2560xf32>
    %c0_1 = arith.constant 0 : index
    %c0_2 = arith.constant 0 : index
    %1 = vector.load %arg2[%c0_1, %c0_2] : memref<2560x128xf32, #tpu.memory_space<vmem>>, vector<2560x128xf32>
    %cst = arith.constant dense<0.000000e+00> : vector<8x128xf32>
    %2 = tpu.matmul %0, %1, %cst {dimension_numbers = #tpu.dot_dimension_numbers<[1], [0], [0], [1], [0, 0, 1, 1], [], []>} : vector<8x2560xf32>, vector<2560x128xf32>, vector<8x128xf32> -> vector<8x128xf32>
    %c0_3 = arith.constant 0 : index
    %c0_4 = arith.constant 0 : index
    %3 = vector.load %arg3[%c0_3, %c0_4] : memref<1x128xf32, #tpu.memory_space<vmem>>, vector<1x128xf32>
    %4 = vector.broadcast %3 : vector<1x128xf32> to vector<8x128xf32>
    %5 = arith.addf %2, %4 : vector<8x128xf32>
    %cst_5 = arith.constant 0.000000e+00 : f32
    %6 = vector.broadcast %cst_5 : f32 to vector<8x128xf32>
    %7 = arith.maximumf %5, %6 : vector<8x128xf32>
    %c0_6 = arith.constant 0 : index
    %c0_7 = arith.constant 0 : index
    %8 = vector.load %arg4[%c0_6, %c0_7] : memref<1x128xf32, #tpu.memory_space<vmem>>, vector<1x128xf32>
    %9 = vector.broadcast %8 : vector<1x128xf32> to vector<8x128xf32>
    %10 = arith.mulf %7, %9 : vector<8x128xf32>
    %cst_8 = arith.constant dense<0.000000e+00> : vector<8xf32>
    %11 = vector.multi_reduction <add>, %10, %cst_8 [1] : vector<8x128xf32> to vector<8xf32>
    %12 = vector.shape_cast %11 : vector<8xf32> to vector<8x1xf32>
    %c0_9 = arith.constant 0 : index
    %c0_10 = arith.constant 0 : index
    %13 = vector.load %arg5[%c0_9, %c0_10] : memref<1x1xf32, #tpu.memory_space<vmem>>, vector<1x1xf32>
    %14 = vector.broadcast %13 : vector<1x1xf32> to vector<8x1xf32>
    %15 = arith.addf %12, %14 : vector<8x1xf32>
    %c0_11 = arith.constant 0 : index
    %c0_12 = arith.constant 0 : index
    %16 = vector.load %arg6[%c0_11, %c0_12] : memref<8x1xf32, #tpu.memory_space<vmem>>, vector<8x1xf32>
    tpu.vector_store %arg6[%c0_11, %c0_12], %15 {strides = array<i32>} : memref<8x1xf32, #tpu.memory_space<vmem>>, vector<8x1xf32>,
    return
  }
  func.func @transform_0(%arg0: i32) -> (i32, i32) {
    %c0_i32 = arith.constant 0 : i32
    %c0_i32_0 = arith.constant 0 : i32
    return %arg0, %c0_i32 : i32, i32
  }
  func.func @transform_1(%arg0: i32) -> (i32, i32) {
    %c0_i32 = arith.constant 0 : i32
    %c0_i32_0 = arith.constant 0 : i32
    %c0_i32_1 = arith.constant 0 : i32
    return %c0_i32, %c0_i32_0 : i32, i32
  }
  func.func @transform_2(%arg0: i32) -> (i32, i32) {
    %c0_i32 = arith.constant 0 : i32
    %c0_i32_0 = arith.constant 0 : i32
    %c0_i32_1 = arith.constant 0 : i32
    return %c0_i32, %c0_i32_0 : i32, i32
  }
  func.func @transform_3(%arg0: i32) -> (i32, i32) {
    %c0_i32 = arith.constant 0 : i32
    %c0_i32_0 = arith.constant 0 : i32
    %c0_i32_1 = arith.constant 0 : i32
    return %c0_i32, %c0_i32_0 : i32, i32
  }
  func.func @transform_4(%arg0: i32) -> (i32, i32) {
    %c0_i32 = arith.constant 0 : i32
    %c0_i32_0 = arith.constant 0 : i32
    %c0_i32_1 = arith.constant 0 : i32
    return %c0_i32, %c0_i32_0 : i32, i32
  }
  func.func @transform_5(%arg0: i32) -> (i32, i32) {
    %c0_i32 = arith.constant 0 : i32
    %c0_i32_0 = arith.constant 0 : i32
    return %arg0, %c0_i32 : i32, i32
  }
}

</mosaic_0001>

<bundles_post_ra>
// kernel: tpu_custom_call.1
= control target key start
LH: loop header
LB: loop body
LE: loop exit
PB: predicated region body
PF: predicated region fallthrough
CT: control target
= control target key end

     0   :  { %s2009_s0 = inlined_call_operand.hbm [shape: f32[8,2560], index: 0, kind: input, shape index: {}]   ;;  %s2010_s1 = inlined_call_operand.hbm [shape: f32[2560,128], index: 1, kind: input, shape index: {}]   ;;  %s2011_s2 = inlined_call_operand.hbm [shape: f32[1,128], index: 2, kind: input, shape index: {}]   ;;  %s2012_s3 = inlined_call_operand.hbm [shape: f32[1,128], index: 3, kind: input, shape index: {}]   ;;  %s2013_s4 = inlined_call_operand.<no memory space> [shape: f32[1,1], index: 4, kind: input, shape index: {}]   ;;  %s2014_s5 = inlined_call_operand.vmem [shape: f32[8,1], index: 5, kind: output, shape index: {}]  }
   0x1   :  { %v10_v0 = vstv %s2013_s4 }
   0x2   :  { %11 = vst [vmem:[#allocation2] sm:$0x1] %v10_v0 }
   0x3   :  { %12 = vsyncpa [#allocation4], 0 }
   0x4   :  { %13 = vsyncpa [#allocation6], 0 }
   0x5   :  { %14 = vsyncpa [#allocation9], 0  ;;  %s1919_s20 = smov [#allocation5]   ;;  %s1825_s24 = scalar_lea.hbm %s2010_s1, 40960 }
   0x6   :  { %s30_s21 = sshll.u32 %s1919_s20, 4  ;;  %p1826_p0 = scmp.ne.s32.totalorder %s2010_s1, %s1825_s24  ;;  %s31_s21 = int_to_ptr.vmem [resolvable:$true] %s30_s21 }
   0x7   :  { %p1829_p1 = scmp.lt.u32.totalorder %s1825_s24, %s2010_s1 }
   0x9   :  { %p1831_p2 = pnand %p1829_p1, %p1826_p0 }
   0xb   :  { %1834 = shalt.err (!%p1831_p2)
}
   0xc   :  { %s1835_s4 = scalar_lea.vmem %s31_s21, 40960  ;;  %p1840_p4 = scmp.lt.s32.totalorder %s31_s21, %s31_s21 }
   0xd   :  { %p1836_p3 = scmp.ne.s32.totalorder %s31_s21, %s1835_s4  ;;  %p1841_p5 = scmp.lt.s32.totalorder %s1835_s4, %s1835_s4 }
   0xf   :  { %p1842_p6 = por %p1841_p5, %p1840_p4 }
  0x11   :  { %p1843_p7 = pnand %p1842_p6, %p1836_p3 }
  0x13   :  { %1846 = shalt.err (!%p1843_p7)
}
  0x14   :  { %s1920_s29 = smov 128   ;;  %s1921_s30 = smov 8  }
  0x15   :  { %36 = dma.hbm_to_vmem [thread:$0]  %s2010_s1, 40960, %s31_s21, [#allocation6], %s1920_s29, %s1920_s29, %s1921_s30  }
  0x16   :  { %s1922_s8 = smov [#allocation3]   ;;  %s1923_s10 = smov [#allocation7]  }
  0x17   :  { %s21_s9 = sshll.u32 %s1922_s8, 4  ;;  %s43_s11 = sshll.u32 %s1923_s10, 4  ;;  %s22_s9 = int_to_ptr.vmem [resolvable:$true] %s21_s9  ;;  %s44_s11 = int_to_ptr.vmem [resolvable:$true] %s43_s11 }
  0x18   :  { %s1847_s14 = scalar_lea.hbm %s2009_s0, 2560 }
  0x19   :  { %p1848_p8 = scmp.ne.s32.totalorder %s2009_s0, %s1847_s14  ;;  %p1851_p9 = scmp.lt.u32.totalorder %s1847_s14, %s2009_s0 }
  0x1b   :  { %p1853_p10 = pnand %p1851_p9, %p1848_p8 }
  0x1d   :  { %1856 = shalt.err (!%p1853_p10)
}
  0x1e   :  { %s1857_s1 = scalar_lea.vmem %s22_s9, 2560  ;;  %p1862_p12 = scmp.lt.s32.totalorder %s22_s9, %s22_s9 }
  0x1f   :  { %p1858_p11 = scmp.ne.s32.totalorder %s22_s9, %s1857_s1  ;;  %p1863_p13 = scmp.lt.s32.totalorder %s1857_s1, %s1857_s1 }
  0x21   :  { %p1864_p0 = por %p1863_p13, %p1862_p12 }
  0x23   :  { %p1865_p1 = pnand %p1864_p0, %p1858_p11 }
  0x25   :  { %1868 = shalt.err (!%p1865_p1)
}
  0x26   :  { %24 = dma.hbm_to_vmem [thread:$0]  %s2009_s0, 2560, %s22_s9, [#allocation4]  }
  0x27   :  { %s1869_s23 = scalar_lea.hbm %s2011_s2, 16 }
  0x28   :  { %p1870_p2 = scmp.ne.s32.totalorder %s2011_s2, %s1869_s23  ;;  %p1873_p3 = scmp.lt.u32.totalorder %s1869_s23, %s2011_s2 }
  0x2a   :  { %p1875_p4 = pnand %p1873_p3, %p1870_p2 }
  0x2c   :  { %1878 = shalt.err (!%p1875_p4)
}
  0x2d   :  { %s1879_s28 = scalar_lea.vmem %s44_s11, 16  ;;  %s1883_s4 = scalar_lea.vmem %s44_s11, 32 }
  0x2e   :  { %p1880_p5 = scmp.ne.s32.totalorder %s44_s11, %s1879_s28  ;;  %p1884_p6 = scmp.lt.s32.totalorder %s44_s11, %s44_s11 }
  0x2f   :  { %p1885_p7 = scmp.lt.s32.totalorder %s1883_s4, %s1879_s28 }
  0x31   :  { %p1886_p8 = por %p1885_p7, %p1884_p6 }
  0x33   :  { %p1887_p9 = pnand %p1886_p8, %p1880_p5 }
  0x35   :  { %1890 = shalt.err (!%p1887_p9)
}
  0x36   :  { %46 = dma.hbm_to_vmem [thread:$0]  %s2011_s2, 16, %s44_s11, [#allocation6]  }
  0x37   :  { %s1924_s30 = smov [#allocation8]   ;;  %s1891_s9 = scalar_lea.hbm %s2012_s3, 16 }
  0x38   :  { %s53_s6 = sshll.u32 %s1924_s30, 4  ;;  %p1892_p10 = scmp.ne.s32.totalorder %s2012_s3, %s1891_s9  ;;  %s54_s6 = int_to_ptr.vmem [resolvable:$true] %s53_s6 }
  0x39   :  { %p1895_p11 = scmp.lt.u32.totalorder %s1891_s9, %s2012_s3 }
  0x3b   :  { %p1897_p12 = pnand %p1895_p11, %p1892_p10 }
  0x3d   :  { %1900 = shalt.err (!%p1897_p12)
}
  0x3e   :  { %s1901_s15 = scalar_lea.vmem %s54_s6, 16  ;;  %s1905_s2 = scalar_lea.vmem %s54_s6, 32 }
  0x3f   :  { %p1902_p13 = scmp.ne.s32.totalorder %s54_s6, %s1901_s15  ;;  %p1906_p0 = scmp.lt.s32.totalorder %s54_s6, %s54_s6 }
  0x40   :  { %p1907_p1 = scmp.lt.s32.totalorder %s1905_s2, %s1901_s15 }
  0x42   :  { %p1908_p2 = por %p1907_p1, %p1906_p0 }
  0x44   :  { %p1909_p3 = pnand %p1908_p2, %p1902_p13 }
  0x46   :  { %1912 = shalt.err (!%p1909_p3)
}
  0x47   :  { %56 = dma.hbm_to_vmem [thread:$0]  %s2012_s3, 16, %s54_s6, [#allocation9]  }
  0x48   :  { %1913 = dma.done.wait [#allocation4], 2560  }
  0x49   :  { %1914 = vsyncadd [#allocation4], 4294964736 }
  0x4a   :  { %1915 = dma.done.wait [#allocation6], 40976  }
  0x4b   :  { %1916 = vsyncadd [#allocation6], 4294926320 }
  0x4c   :  { %1917 = dma.done.wait [#allocation9], 16  }
  0x4d   :  { %1918 = vsyncadd [#allocation9], 4294967280  ;;  %v107_v1 = vld [vmem:[#allocation5 + $0x80] sm:$0xff]  ;;  %v108_v2 = vld [vmem:[#allocation5 + $0x88] sm:$0xff]  ;;  %vm1137_vm0 = vcmask 7168  }
  0x4e   :  { %v91_v3 = vld [vmem:[#allocation5] sm:$0xff]  ;;  %v1499_v4 = vpack.c.bf16 %v108_v2, %v107_v1  ;;  %v92_v5 = vld [vmem:[#allocation5 + $0x8] sm:$0xff]  ;;  %v109_v12 = vld [vmem:[#allocation5 + $0x90] sm:$0xff] }
  0x4f   :  { %v139_v6 = vld [vmem:[#allocation5 + $0x180] sm:$0xff]  ;;  %v140_v7 = vld [vmem:[#allocation5 + $0x188] sm:$0xff]  ;;  %v1501_v8 = vpack.c.bf16 %v92_v5, %v91_v3  ;;  %v110_v14 = vld [vmem:[#allocation5 + $0x98] sm:$0xff] }
  0x50   :  { %v1531_v9 = vpack.c.bf16 %v140_v7, %v139_v6  ;;  %v123_v10 = vld [vmem:[#allocation5 + $0x100] sm:$0xff]  ;;  %v124_v11 = vld [vmem:[#allocation5 + $0x108] sm:$0xff]  ;;  %1500 = vmatprep.subr.bf16.mxu0 %v1499_v4  ;;  %v93_v15 = vld [vmem:[#allocation5 + $0x10] sm:$0xff]  ;;  %v1503_v17 = vpack.c.bf16 %v110_v14, %v109_v12 }
  0x51   :  { %v1533_v13 = vpack.c.bf16 %v124_v11, %v123_v10  ;;  %v94_v16 = vld [vmem:[#allocation5 + $0x18] sm:$0xff]  ;;  %1502 = vmatpush3.bf16.msra.mxu0 %v1501_v8  ;;  %v141_v19 = vld [vmem:[#allocation5 + $0x190] sm:$0xff]  ;;  %v111_v24 = vld [vmem:[#allocation5 + $0xa0] sm:$0xff] }
  0x52   :  { %1532 = vmatprep.subr.bf16.mxu1 %v1531_v9  ;;  %v1505_v18 = vpack.c.bf16 %v94_v16, %v93_v15  ;;  %v142_v20 = vld [vmem:[#allocation5 + $0x198] sm:$0xff]  ;;  %v125_v21 = vld [vmem:[#allocation5 + $0x110] sm:$0xff]  ;;  %v112_v25 = vld [vmem:[#allocation5 + $0xa8] sm:$0xff]  ;;  %1504 = vmatprep.subr.bf16.mxu0 %v1503_v17 }
  0x53   :  { %1534 = vmatpush3.bf16.msra.mxu1 %v1533_v13  ;;  %v1535_v22 = vpack.c.bf16 %v142_v20, %v141_v19  ;;  %v126_v23 = vld [vmem:[#allocation5 + $0x118] sm:$0xff]  ;;  %v1507_v27 = vpack.c.bf16 %v112_v25, %v111_v24  ;;  %v95_v28 = vld [vmem:[#allocation5 + $0x20] sm:$0xff]  ;;  %v96_v29 = vld [vmem:[#allocation5 + $0x28] sm:$0xff] }
  0x54   :  { %v1537_v26 = vpack.c.bf16 %v126_v23, %v125_v21  ;;  %v143_v30 = vld [vmem:[#allocation5 + $0x1a0] sm:$0xff]  ;;  %v144_v31 = vld [vmem:[#allocation5 + $0x1a8] sm:$0xff]  ;;  %v1509_v34 = vpack.c.bf16 %v96_v29, %v95_v28  ;;  %v113_v36 = vld [vmem:[#allocation5 + $0xb0] sm:$0xff] }
  0x55   :  { %1536 = vmatprep.subr.bf16.mxu1 %v1535_v22  ;;  %v127_v32 = vld [vmem:[#allocation5 + $0x120] sm:$0xff]  ;;  %v128_v33 = vld [vmem:[#allocation5 + $0x128] sm:$0xff]  ;;  %1506 = vmatpush3.bf16.msra.mxu0 %v1505_v18  ;;  %v1539_v35 = vpack.c.bf16 %v144_v31, %v143_v30  ;;  %v114_v37 = vld [vmem:[#allocation5 + $0xb8] sm:$0xff] }
  0x56   :  { %v97_v38 = vld [vmem:[#allocation5 + $0x30] sm:$0xff]  ;;  %1508 = vmatprep.subr.bf16.mxu0 %v1507_v27  ;;  %v1541_v39 = vpack.c.bf16 %v128_v33, %v127_v32  ;;  %v1511_v40 = vpack.c.bf16 %v114_v37, %v113_v36  ;;  %v98_v41 = vld [vmem:[#allocation5 + $0x38] sm:$0xff]  ;;  %v115_v47 = vld [vmem:[#allocation5 + $0xc0] sm:$0xff] }
  0x57   :  { %1538 = vmatpush3.bf16.msra.mxu1 %v1537_v26  ;;  %v145_v42 = vld [vmem:[#allocation5 + $0x1b0] sm:$0xff]  ;;  %v146_v43 = vld [vmem:[#allocation5 + $0x1b8] sm:$0xff]  ;;  %v116_v48 = vld [vmem:[#allocation5 + $0xc8] sm:$0xff]  ;;  %v1513_v49 = vpack.c.bf16 %v98_v41, %v97_v38 }
  0x58   :  { %1540 = vmatprep.subr.bf16.mxu1 %v1539_v35  ;;  %v1543_v44 = vpack.c.bf16 %v146_v43, %v145_v42  ;;  %v129_v45 = vld [vmem:[#allocation5 + $0x130] sm:$0xff]  ;;  %v130_v46 = vld [vmem:[#allocation5 + $0x138] sm:$0xff]  ;;  %v147_v50 = vld [vmem:[#allocation5 + $0x1c0] sm:$0xff]  ;;  %v1515_v53 = vpack.c.bf16 %v116_v48, %v115_v47 }
  0x59   :  { %1510 = vmatpush3.bf16.msra.mxu0 %v1509_v34  ;;  %v148_v51 = vld [vmem:[#allocation5 + $0x1c8] sm:$0xff]  ;;  %v1545_v52 = vpack.c.bf16 %v130_v46, %v129_v45  ;;  %v99_v54 = vld [vmem:[#allocation5 + $0x40] sm:$0xff]  ;;  %v117_v59 = vld [vmem:[#allocation5 + $0xd0] sm:$0xff] }
  0x5a   :  { %1512 = vmatprep.subr.bf16.mxu0 %v1511_v40  ;;  %v100_v55 = vld [vmem:[#allocation5 + $0x48] sm:$0xff]  ;;  %v131_v56 = vld [vmem:[#allocation5 + $0x140] sm:$0xff]  ;;  %v1547_v57 = vpack.c.bf16 %v148_v51, %v147_v50  ;;  %v118_v60 = vld [vmem:[#allocation5 + $0xd8] sm:$0xff] }
  0x5b   :  { %1542 = vmatpush3.bf16.msra.mxu1 %v1541_v39  ;;  %v132_v58 = vld [vmem:[#allocation5 + $0x148] sm:$0xff]  ;;  %v149_v61 = vld [vmem:[#allocation5 + $0x1d0] sm:$0xff]  ;;  %v150_v62 = vld [vmem:[#allocation5 + $0x1d8] sm:$0xff]  ;;  %v1517_v63 = vpack.c.bf16 %v100_v55, %v99_v54  ;;  %v1519_v1 = vpack.c.bf16 %v118_v60, %v117_v59 }
  0x5c   :  { %1544 = vmatprep.subr.bf16.mxu1 %v1543_v44  ;;  %v1549_v0 = vpack.c.bf16 %v132_v58, %v131_v56  ;;  %v101_v2 = vld [vmem:[#allocation5 + $0x50] sm:$0xff]  ;;  %v102_v3 = vld [vmem:[#allocation5 + $0x58] sm:$0xff]  ;;  %v1551_v5 = vpack.c.bf16 %v150_v62, %v149_v61  ;;  %v119_v7 = vld [vmem:[#allocation5 + $0xe0] sm:$0xff] }
  0x5d   :  { %1514 = vmatpush3.bf16.msra.mxu0 %v1513_v49  ;;  %v133_v4 = vld [vmem:[#allocation5 + $0x150] sm:$0xff]  ;;  %v134_v6 = vld [vmem:[#allocation5 + $0x158] sm:$0xff]  ;;  %v120_v8 = vld [vmem:[#allocation5 + $0xe8] sm:$0xff]  ;;  %v1521_v11 = vpack.c.bf16 %v102_v3, %v101_v2 }
  0x5e   :  { %1516 = vmatprep.subr.bf16.mxu0 %v1515_v53  ;;  %v151_v9 = vld [vmem:[#allocation5 + $0x1e0] sm:$0xff]  ;;  %v152_v10 = vld [vmem:[#allocation5 + $0x1e8] sm:$0xff]  ;;  %v1553_v14 = vpack.c.bf16 %v134_v6, %v133_v4  ;;  %v1523_v15 = vpack.c.bf16 %v120_v8, %v119_v7  ;;  %v121_v20 = vld [vmem:[#allocation5 + $0xf0] sm:$0xff] }
  0x5f   :  { %1546 = vmatpush3.bf16.msra.mxu1 %v1545_v52  ;;  %v103_v12 = vld [vmem:[#allocation5 + $0x60] sm:$0xff]  ;;  %v104_v13 = vld [vmem:[#allocation5 + $0x68] sm:$0xff]  ;;  %v1555_v19 = vpack.c.bf16 %v152_v10, %v151_v9  ;;  %v122_v21 = vld [vmem:[#allocation5 + $0xf8] sm:$0xff] }
  0x60   :  { %1548 = vmatprep.subr.bf16.mxu1 %v1547_v57  ;;  %v135_v16 = vld [vmem:[#allocation5 + $0x160] sm:$0xff]  ;;  %v136_v17 = vld [vmem:[#allocation5 + $0x168] sm:$0xff]  ;;  %v74_v22 = vld [vmem:[#allocation3 + $0x18] sm:$0xff]  ;;  %v1525_v25 = vpack.c.bf16 %v104_v13, %v103_v12  ;;  %v1527_v27 = vpack.c.bf16 %v122_v21, %v121_v20 }
  0x61   :  { %1518 = vmatpush3.bf16.msra.mxu0 %v1517_v63  ;;  %v72_v18 = vld [vmem:[#allocation3 + $0x8] sm:$0xff]  ;;  %v153_v23 = vld [vmem:[#allocation5 + $0x1f0] sm:$0xff]  ;;  %v154_v24 = vld [vmem:[#allocation5 + $0x1f8] sm:$0xff]  ;;  %552 = vmatprep.mubr.f32.mxu1 %v74_v22  ;;  %v1557_v26 = vpack.c.bf16 %v136_v17, %v135_v16 }
  0x62   :  { %1520 = vmatprep.subr.bf16.mxu0 %v1519_v1  ;;  %482 = vmatprep.mubr.f32.mxu0 %v72_v18  ;;  %v105_v28 = vld [vmem:[#allocation5 + $0x70] sm:$0xff]  ;;  %v106_v29 = vld [vmem:[#allocation5 + $0x78] sm:$0xff]  ;;  %v1559_v31 = vpack.c.bf16 %v154_v24, %v153_v23  ;;  %v171_v33 = vld [vmem:[#allocation5 + $0x280] sm:$0xff] }
  0x63   :  { %1550 = vmatpush3.bf16.msra.mxu1 %v1549_v0  ;;  %v137_v30 = vld [vmem:[#allocation5 + $0x170] sm:$0xff]  ;;  %v138_v32 = vld [vmem:[#allocation5 + $0x178] sm:$0xff]  ;;  %v172_v34 = vld [vmem:[#allocation5 + $0x288] sm:$0xff]  ;;  %v1529_v37 = vpack.c.bf16 %v106_v29, %v105_v28 }
  0x64   :  { %1552 = vmatprep.subr.bf16.mxu1 %v1551_v5  ;;  %v203_v35 = vld [vmem:[#allocation5 + $0x380] sm:$0xff]  ;;  %v204_v36 = vld [vmem:[#allocation5 + $0x388] sm:$0xff]  ;;  %v1561_v38 = vpack.c.bf16 %v138_v32, %v137_v30  ;;  %v1563_v39 = vpack.c.bf16 %v172_v34, %v171_v33  ;;  %v173_v45 = vld [vmem:[#allocation5 + $0x290] sm:$0xff] }
  0x65   :  { %1522 = vmatpush3.bf16.msra.mxu0 %v1521_v11  ;;  %v155_v40 = vld [vmem:[#allocation5 + $0x200] sm:$0xff]  ;;  %v156_v41 = vld [vmem:[#allocation5 + $0x208] sm:$0xff]  ;;  %v1595_v43 = vpack.c.bf16 %v204_v36, %v203_v35  ;;  %v174_v46 = vld [vmem:[#allocation5 + $0x298] sm:$0xff] }
  0x66   :  { %1524 = vmatprep.subr.bf16.mxu0 %v1523_v15  ;;  %v187_v42 = vld [vmem:[#allocation5 + $0x300] sm:$0xff]  ;;  %v188_v44 = vld [vmem:[#allocation5 + $0x308] sm:$0xff]  ;;  %v205_v47 = vld [vmem:[#allocation5 + $0x390] sm:$0xff]  ;;  %v1565_v50 = vpack.c.bf16 %v156_v41, %v155_v40  ;;  %v1567_v53 = vpack.c.bf16 %v174_v46, %v173_v45 }
  0x67   :  { %1554 = vmatpush3.bf16.msra.mxu1 %v1553_v14  ;;  %v206_v48 = vld [vmem:[#allocation5 + $0x398] sm:$0xff]  ;;  %v71_v49 = vld [vmem:[#allocation3] sm:$0xff]  ;;  %v73_v51 = vld [vmem:[#allocation3 + $0x10] sm:$0xff]  ;;  %v1597_v52 = vpack.c.bf16 %v188_v44, %v187_v42 }
  0x68   :  { %1556 = vmatprep.subr.bf16.mxu1 %v1555_v19  ;;  %v157_v54 = vld [vmem:[#allocation5 + $0x210] sm:$0xff]  ;;  %v158_v55 = vld [vmem:[#allocation5 + $0x218] sm:$0xff]  ;;  %v1599_v57 = vpack.c.bf16 %v206_v48, %v205_v47  ;;  %v175_v59 = vld [vmem:[#allocation5 + $0x2a0] sm:$0xff] }
  0x69   :  { %1526 = vmatpush3.bf16.msra.mxu0 %v1525_v25  ;;  %v189_v56 = vld [vmem:[#allocation5 + $0x310] sm:$0xff]  ;;  %v190_v58 = vld [vmem:[#allocation5 + $0x318] sm:$0xff]  ;;  %v176_v60 = vld [vmem:[#allocation5 + $0x2a8] sm:$0xff]  ;;  %v1569_v63 = vpack.c.bf16 %v158_v55, %v157_v54 }
  0x6a   :  { %1528 = vmatprep.subr.bf16.mxu0 %v1527_v27  ;;  %v207_v61 = vld [vmem:[#allocation5 + $0x3a0] sm:$0xff]  ;;  %v208_v62 = vld [vmem:[#allocation5 + $0x3a8] sm:$0xff]  ;;  %v1601_v0 = vpack.c.bf16 %v190_v58, %v189_v56  ;;  %v1571_v1 = vpack.c.bf16 %v176_v60, %v175_v59  ;;  %v177_v7 = vld [vmem:[#allocation5 + $0x2b0] sm:$0xff] }
  0x6b   :  { %1558 = vmatpush3.bf16.msra.mxu1 %v1557_v26  ;;  %v159_v2 = vld [vmem:[#allocation5 + $0x220] sm:$0xff]  ;;  %v160_v3 = vld [vmem:[#allocation5 + $0x228] sm:$0xff]  ;;  %v1603_v5 = vpack.c.bf16 %v208_v62, %v207_v61  ;;  %v178_v8 = vld [vmem:[#allocation5 + $0x2b8] sm:$0xff] }
  0x6c   :  { %1560 = vmatprep.subr.bf16.mxu1 %v1559_v31  ;;  %v191_v4 = vld [vmem:[#allocation5 + $0x320] sm:$0xff]  ;;  %v192_v6 = vld [vmem:[#allocation5 + $0x328] sm:$0xff]  ;;  %v209_v9 = vld [vmem:[#allocation5 + $0x3b0] sm:$0xff]  ;;  %v1573_v11 = vpack.c.bf16 %v160_v3, %v159_v2  ;;  %v1575_v13 = vpack.c.bf16 %v178_v8, %v177_v7 }
  0x6d   :  { %1530 = vmatpush3.bf16.msra.mxu0 %v1529_v37  ;;  %v210_v10 = vld [vmem:[#allocation5 + $0x3b8] sm:$0xff]  ;;  %v1605_v12 = vpack.c.bf16 %v192_v6, %v191_v4  ;;  %v161_v14 = vld [vmem:[#allocation5 + $0x230] sm:$0xff]  ;;  %v179_v19 = vld [vmem:[#allocation5 + $0x2c0] sm:$0xff] }
  0x6e   :  { %1564 = vmatprep.subr.bf16.mxu0 %v1563_v39  ;;  %v162_v15 = vld [vmem:[#allocation5 + $0x238] sm:$0xff]  ;;  %v193_v16 = vld [vmem:[#allocation5 + $0x330] sm:$0xff]  ;;  %v1607_v17 = vpack.c.bf16 %v210_v10, %v209_v9  ;;  %v180_v20 = vld [vmem:[#allocation5 + $0x2c8] sm:$0xff] }
  0x6f   :  { %1562 = vmatpush3.bf16.msra.mxu1 %v1561_v38  ;;  %v194_v18 = vld [vmem:[#allocation5 + $0x338] sm:$0xff]  ;;  %v211_v21 = vld [vmem:[#allocation5 + $0x3c0] sm:$0xff]  ;;  %v212_v22 = vld [vmem:[#allocation5 + $0x3c8] sm:$0xff]  ;;  %v1577_v23 = vpack.c.bf16 %v162_v15, %v161_v14  ;;  %v1579_v27 = vpack.c.bf16 %v180_v20, %v179_v19 }
  0x70   :  { %1596 = vmatprep.subr.bf16.mxu1 %v1595_v43  ;;  %483 = vmatmul.mubr.f32.vlgmr.msra.gmra.mrb[0].mxu0 %v71_v49  ;;  %v163_v24 = vld [vmem:[#allocation5 + $0x240] sm:$0xff]  ;;  %v76_v25 = vld [vmem:[#allocation3 + $0x28] sm:$0xff]  ;;  %v1609_v26 = vpack.c.bf16 %v194_v18, %v193_v16  ;;  %v78_v30 = vld [vmem:[#allocation3 + $0x38] sm:$0xff]  ;;  %v1611_v31 = vpack.c.bf16 %v212_v22, %v211_v21 }
  0x71   :  { %1566 = vmatpush3.bf16.msra.mxu0 %v1565_v50  ;;  %v164_v28 = vld [vmem:[#allocation5 + $0x248] sm:$0xff]  ;;  %v195_v29 = vld [vmem:[#allocation5 + $0x340] sm:$0xff]  ;;  %v181_v33 = vld [vmem:[#allocation5 + $0x2d0] sm:$0xff]  ;;  %622 = vmatprep.mubr.f32.mxu0 %v76_v25 }
  0x72   :  { %553 = vmatmul.mubr.f32.vlgmr.msra.gmra.mrb[0].mxu1 %v73_v51  ;;  %1568 = vmatprep.subr.bf16.mxu0 %v1567_v53  ;;  %v196_v32 = vld [vmem:[#allocation5 + $0x348] sm:$0xff]  ;;  %v182_v34 = vld [vmem:[#allocation5 + $0x2d8] sm:$0xff]  ;;  %v213_v35 = vld [vmem:[#allocation5 + $0x3d0] sm:$0xff]  ;;  %v1581_v37 = vpack.c.bf16 %v164_v28, %v163_v24 }
  0x73   :  { %1598 = vmatpush3.bf16.msra.mxu1 %v1597_v52  ;;  %v214_v36 = vld [vmem:[#allocation5 + $0x3d8] sm:$0xff]  ;;  %692 = vmatprep.mubr.f32.mxu1 %v78_v30  ;;  %v1613_v38 = vpack.c.bf16 %v196_v32, %v195_v29  ;;  %v1583_v39 = vpack.c.bf16 %v182_v34, %v181_v33  ;;  %v165_v40 = vld [vmem:[#allocation5 + $0x250] sm:$0xff]  ;;  %v183_v45 = vld [vmem:[#allocation5 + $0x2e0] sm:$0xff] }
  0x74   :  { %1600 = vmatprep.subr.bf16.mxu1 %v1599_v57  ;;  %v166_v41 = vld [vmem:[#allocation5 + $0x258] sm:$0xff]  ;;  %v197_v42 = vld [vmem:[#allocation5 + $0x350] sm:$0xff]  ;;  %v1615_v43 = vpack.c.bf16 %v214_v36, %v213_v35  ;;  %v184_v46 = vld [vmem:[#allocation5 + $0x2e8] sm:$0xff] }
  0x75   :  { %1570 = vmatpush3.bf16.msra.mxu0 %v1569_v63  ;;  %v198_v44 = vld [vmem:[#allocation5 + $0x358] sm:$0xff]  ;;  %v215_v47 = vld [vmem:[#allocation5 + $0x3e0] sm:$0xff]  ;;  %v216_v48 = vld [vmem:[#allocation5 + $0x3e8] sm:$0xff]  ;;  %v1585_v49 = vpack.c.bf16 %v166_v41, %v165_v40  ;;  %v1587_v51 = vpack.c.bf16 %v184_v46, %v183_v45 }
  0x76   :  { %1572 = vmatprep.subr.bf16.mxu0 %v1571_v1  ;;  %v1617_v50 = vpack.c.bf16 %v198_v44, %v197_v42  ;;  %v167_v52 = vld [vmem:[#allocation5 + $0x260] sm:$0xff]  ;;  %v168_v53 = vld [vmem:[#allocation5 + $0x268] sm:$0xff]  ;;  %v1619_v55 = vpack.c.bf16 %v216_v48, %v215_v47  ;;  %v185_v57 = vld [vmem:[#allocation5 + $0x2f0] sm:$0xff] }
  0x77   :  { %1602 = vmatpush3.bf16.msra.mxu1 %v1601_v0  ;;  %v199_v54 = vld [vmem:[#allocation5 + $0x360] sm:$0xff]  ;;  %v200_v56 = vld [vmem:[#allocation5 + $0x368] sm:$0xff]  ;;  %v186_v58 = vld [vmem:[#allocation5 + $0x2f8] sm:$0xff]  ;;  %v1589_v61 = vpack.c.bf16 %v168_v53, %v167_v52 }
  0x78   :  { %1604 = vmatprep.subr.bf16.mxu1 %v1603_v5  ;;  %v217_v59 = vld [vmem:[#allocation5 + $0x3f0] sm:$0xff]  ;;  %v218_v60 = vld [vmem:[#allocation5 + $0x3f8] sm:$0xff]  ;;  %v1621_v62 = vpack.c.bf16 %v200_v56, %v199_v54  ;;  %v1591_v63 = vpack.c.bf16 %v186_v58, %v185_v57  ;;  %v235_v5 = vld [vmem:[#allocation5 + $0x480] sm:$0xff] }
  0x79   :  { %1574 = vmatpush3.bf16.msra.mxu0 %v1573_v11  ;;  %v169_v0 = vld [vmem:[#allocation5 + $0x270] sm:$0xff]  ;;  %v170_v1 = vld [vmem:[#allocation5 + $0x278] sm:$0xff]  ;;  %v1623_v3 = vpack.c.bf16 %v218_v60, %v217_v59  ;;  %v236_v6 = vld [vmem:[#allocation5 + $0x488] sm:$0xff] }
  0x7a   :  { %1576 = vmatprep.subr.bf16.mxu0 %v1575_v13  ;;  %v201_v2 = vld [vmem:[#allocation5 + $0x370] sm:$0xff]  ;;  %v202_v4 = vld [vmem:[#allocation5 + $0x378] sm:$0xff]  ;;  %v267_v7 = vld [vmem:[#allocation5 + $0x580] sm:$0xff]  ;;  %v1593_v9 = vpack.c.bf16 %v170_v1, %v169_v0  ;;  %v1627_v11 = vpack.c.bf16 %v236_v6, %v235_v5 }
  0x7b   :  { %1606 = vmatpush3.bf16.msra.mxu1 %v1605_v12  ;;  %v268_v8 = vld [vmem:[#allocation5 + $0x588] sm:$0xff]  ;;  %v1625_v10 = vpack.c.bf16 %v202_v4, %v201_v2  ;;  %v219_v12 = vld [vmem:[#allocation5 + $0x400] sm:$0xff]  ;;  %v238_v18 = vld [vmem:[#allocation5 + $0x498] sm:$0xff] }
  0x7c   :  { %1608 = vmatprep.subr.bf16.mxu1 %v1607_v17  ;;  %v220_v13 = vld [vmem:[#allocation5 + $0x408] sm:$0xff]  ;;  %v251_v14 = vld [vmem:[#allocation5 + $0x500] sm:$0xff]  ;;  %v1659_v15 = vpack.c.bf16 %v268_v8, %v267_v7  ;;  %v237_v17 = vld [vmem:[#allocation5 + $0x490] sm:$0xff] }
  0x7d   :  { %1578 = vmatpush3.bf16.msra.mxu0 %v1577_v23  ;;  %v252_v16 = vld [vmem:[#allocation5 + $0x508] sm:$0xff]  ;;  %v269_v19 = vld [vmem:[#allocation5 + $0x590] sm:$0xff]  ;;  %v270_v20 = vld [vmem:[#allocation5 + $0x598] sm:$0xff]  ;;  %v1629_v22 = vpack.c.bf16 %v220_v13, %v219_v12  ;;  %v1631_v25 = vpack.c.bf16 %v238_v18, %v237_v17 }
  0x7e   :  { %1580 = vmatprep.subr.bf16.mxu0 %v1579_v27  ;;  %v75_v21 = vld [vmem:[#allocation3 + $0x20] sm:$0xff]  ;;  %v77_v23 = vld [vmem:[#allocation3 + $0x30] sm:$0xff]  ;;  %v1661_v24 = vpack.c.bf16 %v252_v16, %v251_v14  ;;  %v222_v27 = vld [vmem:[#allocation5 + $0x418] sm:$0xff]  ;;  %v1663_v29 = vpack.c.bf16 %v270_v20, %v269_v19 }
  0x7f   :  { %1610 = vmatpush3.bf16.msra.mxu1 %v1609_v26  ;;  %v221_v26 = vld [vmem:[#allocation5 + $0x410] sm:$0xff]  ;;  %v254_v30 = vld [vmem:[#allocation5 + $0x518] sm:$0xff]  ;;  %v240_v32 = vld [vmem:[#allocation5 + $0x4a8] sm:$0xff] }
  0x80   :  { %1612 = vmatprep.subr.bf16.mxu1 %v1611_v31  ;;  %v253_v28 = vld [vmem:[#allocation5 + $0x510] sm:$0xff]  ;;  %v239_v31 = vld [vmem:[#allocation5 + $0x4a0] sm:$0xff]  ;;  %v272_v34 = vld [vmem:[#allocation5 + $0x5a8] sm:$0xff]  ;;  %v1633_v36 = vpack.c.bf16 %v222_v27, %v221_v26 }
  0x81   :  { %1582 = vmatpush3.bf16.msra.mxu0 %v1581_v37  ;;  %v271_v33 = vld [vmem:[#allocation5 + $0x5a0] sm:$0xff]  ;;  %v80_v35 = vld [vmem:[#allocation3 + $0x48] sm:$0xff]  ;;  %v82_v37 = vld [vmem:[#allocation3 + $0x58] sm:$0xff] }
  0x82   :  { %1584 = vmatprep.subr.bf16.mxu0 %v1583_v39  ;;  %v1635_v39 = vpack.c.bf16 %v240_v32, %v239_v31  ;;  %v223_v40 = vld [vmem:[#allocation5 + $0x420] sm:$0xff]  ;;  %v224_v41 = vld [vmem:[#allocation5 + $0x428] sm:$0xff]  ;;  %v241_v45 = vld [vmem:[#allocation5 + $0x4b0] sm:$0xff] }
  0x83   :  { %1614 = vmatpush3.bf16.msra.mxu1 %v1613_v38  ;;  %v1665_v38 = vpack.c.bf16 %v254_v30, %v253_v28  ;;  %v255_v42 = vld [vmem:[#allocation5 + $0x520] sm:$0xff]  ;;  %v256_v44 = vld [vmem:[#allocation5 + $0x528] sm:$0xff]  ;;  %v242_v46 = vld [vmem:[#allocation5 + $0x4b8] sm:$0xff] }
  0x84   :  { %1616 = vmatprep.subr.bf16.mxu1 %v1615_v43  ;;  %v1667_v43 = vpack.c.bf16 %v272_v34, %v271_v33  ;;  %v273_v47 = vld [vmem:[#allocation5 + $0x5b0] sm:$0xff]  ;;  %v274_v48 = vld [vmem:[#allocation5 + $0x5b8] sm:$0xff]  ;;  %v243_v57 = vld [vmem:[#allocation5 + $0x4c0] sm:$0xff] }
  0x85   :  { %1586 = vmatpush3.bf16.msra.mxu0 %v1585_v49  ;;  %v1637_v49 = vpack.c.bf16 %v224_v41, %v223_v40  ;;  %v225_v52 = vld [vmem:[#allocation5 + $0x430] sm:$0xff]  ;;  %v226_v53 = vld [vmem:[#allocation5 + $0x438] sm:$0xff]  ;;  %v244_v58 = vld [vmem:[#allocation5 + $0x4c8] sm:$0xff] }
  0x86   :  { %1588 = vmatprep.subr.bf16.mxu0 %v1587_v51  ;;  %v1639_v51 = vpack.c.bf16 %v242_v46, %v241_v45  ;;  %v257_v54 = vld [vmem:[#allocation5 + $0x530] sm:$0xff]  ;;  %v258_v56 = vld [vmem:[#allocation5 + $0x538] sm:$0xff]  ;;  %v275_v59 = vld [vmem:[#allocation5 + $0x5c0] sm:$0xff] }
  0x87   :  { %1618 = vmatpush3.bf16.msra.mxu1 %v1617_v50  ;;  %v1669_v50 = vpack.c.bf16 %v256_v44, %v255_v42  ;;  %v276_v60 = vld [vmem:[#allocation5 + $0x5c8] sm:$0xff]  ;;  %v227_v0 = vld [vmem:[#allocation5 + $0x440] sm:$0xff]  ;;  %v245_v5 = vld [vmem:[#allocation5 + $0x4d0] sm:$0xff] }
  0x88   :  { %1620 = vmatprep.subr.bf16.mxu1 %v1619_v55  ;;  %v1671_v55 = vpack.c.bf16 %v274_v48, %v273_v47  ;;  %v228_v1 = vld [vmem:[#allocation5 + $0x448] sm:$0xff]  ;;  %v259_v2 = vld [vmem:[#allocation5 + $0x540] sm:$0xff]  ;;  %v246_v6 = vld [vmem:[#allocation5 + $0x4d8] sm:$0xff] }
  0x89   :  { %1590 = vmatpush3.bf16.msra.mxu0 %v1589_v61  ;;  %v1641_v61 = vpack.c.bf16 %v226_v53, %v225_v52  ;;  %v260_v4 = vld [vmem:[#allocation5 + $0x548] sm:$0xff]  ;;  %v277_v7 = vld [vmem:[#allocation5 + $0x5d0] sm:$0xff]  ;;  %v278_v8 = vld [vmem:[#allocation5 + $0x5d8] sm:$0xff] }
  0x8a   :  { %1592 = vmatprep.subr.bf16.mxu0 %v1591_v63  ;;  %v1643_v63 = vpack.c.bf16 %v244_v58, %v243_v57  ;;  %v229_v12 = vld [vmem:[#allocation5 + $0x450] sm:$0xff]  ;;  %v230_v13 = vld [vmem:[#allocation5 + $0x458] sm:$0xff]  ;;  %v247_v17 = vld [vmem:[#allocation5 + $0x4e0] sm:$0xff] }
  0x8b   :  { %1622 = vmatpush3.bf16.msra.mxu1 %v1621_v62  ;;  %v1673_v62 = vpack.c.bf16 %v258_v56, %v257_v54  ;;  %v261_v14 = vld [vmem:[#allocation5 + $0x550] sm:$0xff]  ;;  %v262_v16 = vld [vmem:[#allocation5 + $0x558] sm:$0xff]  ;;  %v248_v18 = vld [vmem:[#allocation5 + $0x4e8] sm:$0xff] }
  0x8c   :  { %1624 = vmatprep.subr.bf16.mxu1 %v1623_v3  ;;  %v1675_v3 = vpack.c.bf16 %v276_v60, %v275_v59  ;;  %v279_v19 = vld [vmem:[#allocation5 + $0x5e0] sm:$0xff]  ;;  %v280_v20 = vld [vmem:[#allocation5 + $0x5e8] sm:$0xff]  ;;  %v250_v30 = vld [vmem:[#allocation5 + $0x4f8] sm:$0xff] }
  0x8d   :  { %1594 = vmatpush3.bf16.msra.mxu0 %v1593_v9  ;;  %v1645_v9 = vpack.c.bf16 %v228_v1, %v227_v0  ;;  %v263_v26 = vld [vmem:[#allocation5 + $0x560] sm:$0xff]  ;;  %v1683_v27 = vpack.c.bf16 %v280_v20, %v279_v19  ;;  %v264_v28 = vld [vmem:[#allocation5 + $0x568] sm:$0xff]  ;;  %v281_v31 = vld [vmem:[#allocation5 + $0x5f0] sm:$0xff] }
  0x8e   :  { %1628 = vmatprep.subr.bf16.mxu0 %v1627_v11  ;;  %v1647_v11 = vpack.c.bf16 %v246_v6, %v245_v5  ;;  %v282_v32 = vld [vmem:[#allocation5 + $0x5f8] sm:$0xff]  ;;  %v1685_v34 = vpack.c.bf16 %v264_v28, %v263_v26  ;;  %v299_v41 = vld [vmem:[#allocation5 + $0x680] sm:$0xff]  ;;  %v300_v42 = vld [vmem:[#allocation5 + $0x688] sm:$0xff] }
  0x8f   :  { %1626 = vmatpush3.bf16.msra.mxu1 %v1625_v10  ;;  %v1677_v10 = vpack.c.bf16 %v260_v4, %v259_v2  ;;  %v266_v40 = vld [vmem:[#allocation5 + $0x578] sm:$0xff]  ;;  %v332_v44 = vld [vmem:[#allocation5 + $0x788] sm:$0xff]  ;;  %v1691_v47 = vpack.c.bf16 %v300_v42, %v299_v41  ;;  %v283_v48 = vld [vmem:[#allocation5 + $0x600] sm:$0xff] }
  0x90   :  { %1660 = vmatprep.subr.bf16.mxu1 %v1659_v15  ;;  %623 = vmatmul.mubr.f32.vlgmr.msra.gmra.mrb[2].mxu0 %v75_v21  ;;  %v1679_v15 = vpack.c.bf16 %v278_v8, %v277_v7  ;;  %v1649_v21 = vpack.c.bf16 %v230_v13, %v229_v12  ;;  %v316_v52 = vld [vmem:[#allocation5 + $0x708] sm:$0xff]  ;;  %v301_v53 = vld [vmem:[#allocation5 + $0x690] sm:$0xff]  ;;  %v302_v54 = vld [vmem:[#allocation5 + $0x698] sm:$0xff] }
  0x91   :  { %1630 = vmatpush3.bf16.msra.mxu0 %v1629_v22  ;;  %762 = vmatprep.mubr.f32.mxu0 %v80_v35  ;;  %v1681_v22 = vpack.c.bf16 %v262_v16, %v261_v14  ;;  %v334_v56 = vld [vmem:[#allocation5 + $0x798] sm:$0xff]  ;;  %v79_v57 = vld [vmem:[#allocation3 + $0x40] sm:$0xff]  ;;  %v81_v59 = vld [vmem:[#allocation3 + $0x50] sm:$0xff] }
  0x92   :  { %693 = vmatmul.mubr.f32.vlgmr.msra.gmra.mrb[2].mxu1 %v77_v23  ;;  %1632 = vmatprep.subr.bf16.mxu0 %v1631_v25  ;;  %v1651_v23 = vpack.c.bf16 %v248_v18, %v247_v17  ;;  %v232_v25 = vld [vmem:[#allocation5 + $0x468] sm:$0xff]  ;;  %v317_v0 = vld [vmem:[#allocation5 + $0x710] sm:$0xff]  ;;  %v318_v2 = vld [vmem:[#allocation5 + $0x718] sm:$0xff] }
  0x93   :  { %1662 = vmatpush3.bf16.msra.mxu1 %v1661_v24  ;;  %832 = vmatprep.mubr.f32.mxu1 %v82_v37  ;;  %v231_v24 = vld [vmem:[#allocation5 + $0x460] sm:$0xff]  ;;  %v234_v37 = vld [vmem:[#allocation5 + $0x478] sm:$0xff]  ;;  %v304_v4 = vld [vmem:[#allocation5 + $0x6a8] sm:$0xff] }
  0x94   :  { %1664 = vmatprep.subr.bf16.mxu1 %v1663_v29  ;;  %v249_v29 = vld [vmem:[#allocation5 + $0x4f0] sm:$0xff]  ;;  %v1653_v33 = vpack.c.bf16 %v232_v25, %v231_v24  ;;  %v335_v5 = vld [vmem:[#allocation5 + $0x7a0] sm:$0xff]  ;;  %v336_v6 = vld [vmem:[#allocation5 + $0x7a8] sm:$0xff] }
  0x95   :  { %1634 = vmatpush3.bf16.msra.mxu0 %v1633_v36  ;;  %v1655_v35 = vpack.c.bf16 %v250_v30, %v249_v29  ;;  %v233_v36 = vld [vmem:[#allocation5 + $0x470] sm:$0xff]  ;;  %v84_v7 = vld [vmem:[#allocation3 + $0x68] sm:$0xff]  ;;  %v287_v12 = vld [vmem:[#allocation5 + $0x620] sm:$0xff] }
  0x96   :  { %1636 = vmatprep.subr.bf16.mxu0 %v1635_v39  ;;  %v1687_v39 = vpack.c.bf16 %v282_v32, %v281_v31  ;;  %v1657_v45 = vpack.c.bf16 %v234_v37, %v233_v36  ;;  %v288_v13 = vld [vmem:[#allocation5 + $0x628] sm:$0xff]  ;;  %v319_v14 = vld [vmem:[#allocation5 + $0x720] sm:$0xff]  ;;  %v305_v17 = vld [vmem:[#allocation5 + $0x6b0] sm:$0xff] }
  0x97   :  { %1666 = vmatpush3.bf16.msra.mxu1 %v1665_v38  ;;  %v265_v38 = vld [vmem:[#allocation5 + $0x570] sm:$0xff]  ;;  %v320_v16 = vld [vmem:[#allocation5 + $0x728] sm:$0xff]  ;;  %v306_v18 = vld [vmem:[#allocation5 + $0x6b8] sm:$0xff] }
  0x98   :  { %1668 = vmatprep.subr.bf16.mxu1 %v1667_v43  ;;  %v331_v43 = vld [vmem:[#allocation5 + $0x780] sm:$0xff]  ;;  %v1689_v46 = vpack.c.bf16 %v266_v40, %v265_v38  ;;  %v337_v19 = vld [vmem:[#allocation5 + $0x7b0] sm:$0xff]  ;;  %v338_v20 = vld [vmem:[#allocation5 + $0x7b8] sm:$0xff] }
  0x99   :  { %1638 = vmatpush3.bf16.msra.mxu0 %v1637_v49  ;;  %v284_v49 = vld [vmem:[#allocation5 + $0x608] sm:$0xff]  ;;  %v289_v24 = vld [vmem:[#allocation5 + $0x630] sm:$0xff]  ;;  %v290_v25 = vld [vmem:[#allocation5 + $0x638] sm:$0xff] }
  0x9a   :  { %1640 = vmatprep.subr.bf16.mxu0 %v1639_v51  ;;  %v1723_v51 = vpack.c.bf16 %v332_v44, %v331_v43  ;;  %v1693_v58 = vpack.c.bf16 %v284_v49, %v283_v48  ;;  %v321_v26 = vld [vmem:[#allocation5 + $0x730] sm:$0xff]  ;;  %v322_v28 = vld [vmem:[#allocation5 + $0x738] sm:$0xff]  ;;  %v307_v29 = vld [vmem:[#allocation5 + $0x6c0] sm:$0xff] }
  0x9b   :  { %1670 = vmatpush3.bf16.msra.mxu1 %v1669_v50  ;;  %v315_v50 = vld [vmem:[#allocation5 + $0x700] sm:$0xff]  ;;  %v308_v30 = vld [vmem:[#allocation5 + $0x6c8] sm:$0xff]  ;;  %v309_v41 = vld [vmem:[#allocation5 + $0x6d0] sm:$0xff] }
  0x9c   :  { %1672 = vmatprep.subr.bf16.mxu1 %v1671_v55  ;;  %v333_v55 = vld [vmem:[#allocation5 + $0x790] sm:$0xff]  ;;  %v1725_v60 = vpack.c.bf16 %v316_v52, %v315_v50  ;;  %v339_v31 = vld [vmem:[#allocation5 + $0x7c0] sm:$0xff]  ;;  %v340_v32 = vld [vmem:[#allocation5 + $0x7c8] sm:$0xff] }
  0x9d   :  { %1642 = vmatpush3.bf16.msra.mxu0 %v1641_v61  ;;  %v1695_v61 = vpack.c.bf16 %v302_v54, %v301_v53  ;;  %v1727_v1 = vpack.c.bf16 %v334_v56, %v333_v55  ;;  %v291_v36 = vld [vmem:[#allocation5 + $0x640] sm:$0xff]  ;;  %v292_v37 = vld [vmem:[#allocation5 + $0x648] sm:$0xff]  ;;  %v310_v42 = vld [vmem:[#allocation5 + $0x6d8] sm:$0xff] }
  0x9e   :  { %1644 = vmatprep.subr.bf16.mxu0 %v1643_v63  ;;  %v286_v63 = vld [vmem:[#allocation5 + $0x618] sm:$0xff]  ;;  %v323_v38 = vld [vmem:[#allocation5 + $0x740] sm:$0xff]  ;;  %v324_v40 = vld [vmem:[#allocation5 + $0x748] sm:$0xff] }
  0x9f   :  { %1674 = vmatpush3.bf16.msra.mxu1 %v1673_v62  ;;  %v285_v62 = vld [vmem:[#allocation5 + $0x610] sm:$0xff]  ;;  %v342_v44 = vld [vmem:[#allocation5 + $0x7d8] sm:$0xff]  ;;  %v311_v53 = vld [vmem:[#allocation5 + $0x6e0] sm:$0xff] }
  0xa0   :  { %1676 = vmatprep.subr.bf16.mxu1 %v1675_v3  ;;  %v303_v3 = vld [vmem:[#allocation5 + $0x6a0] sm:$0xff]  ;;  %v1697_v8 = vpack.c.bf16 %v286_v63, %v285_v62  ;;  %v341_v43 = vld [vmem:[#allocation5 + $0x7d0] sm:$0xff]  ;;  %v294_v49 = vld [vmem:[#allocation5 + $0x658] sm:$0xff] }
  0xa1   :  { %1646 = vmatpush3.bf16.msra.mxu0 %v1645_v9  ;;  %v86_v9 = vld [vmem:[#allocation3 + $0x78] sm:$0xff]  ;;  %v293_v48 = vld [vmem:[#allocation5 + $0x650] sm:$0xff]  ;;  %v312_v54 = vld [vmem:[#allocation5 + $0x6e8] sm:$0xff] }
  0xa2   :  { %1648 = vmatprep.subr.bf16.mxu0 %v1647_v11  ;;  %v1699_v11 = vpack.c.bf16 %v304_v4, %v303_v3  ;;  %v325_v50 = vld [vmem:[#allocation5 + $0x750] sm:$0xff]  ;;  %v326_v52 = vld [vmem:[#allocation5 + $0x758] sm:$0xff]  ;;  %v343_v55 = vld [vmem:[#allocation5 + $0x7e0] sm:$0xff] }
  0xa3   :  { %1678 = vmatpush3.bf16.msra.mxu1 %v1677_v10  ;;  %v1729_v10 = vpack.c.bf16 %v318_v2, %v317_v0  ;;  %v344_v56 = vld [vmem:[#allocation5 + $0x7e8] sm:$0xff]  ;;  %v327_v62 = vld [vmem:[#allocation5 + $0x760] sm:$0xff]  ;;  %v314_v2 = vld [vmem:[#allocation5 + $0x6f8] sm:$0xff] }
  0xa4   :  { %1680 = vmatprep.subr.bf16.mxu1 %v1679_v15  ;;  %v1731_v15 = vpack.c.bf16 %v336_v6, %v335_v5  ;;  %v1747_v63 = vpack.c.bf16 %v344_v56, %v343_v55  ;;  %v328_v0 = vld [vmem:[#allocation5 + $0x768] sm:$0xff]  ;;  %v345_v3 = vld [vmem:[#allocation5 + $0x7f0] sm:$0xff]  ;;  %v346_v4 = vld [vmem:[#allocation5 + $0x7f8] sm:$0xff] }
  0xa5   :  { %1650 = vmatpush3.bf16.msra.mxu0 %v1649_v21  ;;  %v1701_v21 = vpack.c.bf16 %v288_v13, %v287_v12  ;;  %v1749_v6 = vpack.c.bf16 %v328_v0, %v327_v62  ;;  %v330_v12 = vld [vmem:[#allocation5 + $0x778] sm:$0xff]  ;;  %v363_v13 = vld [vmem:[#allocation5 + $0x880] sm:$0xff]  ;;  %v401_v55 = vld [vmem:[#allocation5 + $0x9b0] sm:$0xff] }
  0xa6   :  { %1652 = vmatprep.subr.bf16.mxu0 %v1651_v23  ;;  %v1703_v23 = vpack.c.bf16 %v306_v18, %v305_v17  ;;  %v402_v56 = vld [vmem:[#allocation5 + $0x9b8] sm:$0xff]  ;;  %v385_v62 = vld [vmem:[#allocation5 + $0x930] sm:$0xff] }
  0xa7   :  { %1682 = vmatpush3.bf16.msra.mxu1 %v1681_v22  ;;  %v1733_v22 = vpack.c.bf16 %v320_v16, %v319_v14  ;;  %v364_v14 = vld [vmem:[#allocation5 + $0x888] sm:$0xff]  ;;  %v386_v0 = vld [vmem:[#allocation5 + $0x938] sm:$0xff] }
  0xa8   :  { %1684 = vmatprep.subr.bf16.mxu1 %v1683_v27  ;;  %v1735_v27 = vpack.c.bf16 %v338_v20, %v337_v19  ;;  %v396_v16 = vld [vmem:[#allocation5 + $0x988] sm:$0xff]  ;;  %v1755_v19 = vpack.c.bf16 %v364_v14, %v363_v13  ;;  %v347_v20 = vld [vmem:[#allocation5 + $0x800] sm:$0xff]  ;;  %v373_v13 = vld [vmem:[#allocation5 + $0x8d0] sm:$0xff] }
  0xa9   :  { %1654 = vmatpush3.bf16.msra.mxu0 %v1653_v33  ;;  %v1705_v33 = vpack.c.bf16 %v290_v25, %v289_v24  ;;  %v380_v24 = vld [vmem:[#allocation5 + $0x908] sm:$0xff]  ;;  %v365_v25 = vld [vmem:[#allocation5 + $0x890] sm:$0xff]  ;;  %v374_v14 = vld [vmem:[#allocation5 + $0x8d8] sm:$0xff] }
  0xaa   :  { %1656 = vmatprep.subr.bf16.mxu0 %v1655_v35  ;;  %v1707_v35 = vpack.c.bf16 %v308_v30, %v307_v29  ;;  %v83_v29 = vld [vmem:[#allocation3 + $0x60] sm:$0xff] }
  0xab   :  { %1686 = vmatpush3.bf16.msra.mxu1 %v1685_v34  ;;  %v1737_v34 = vpack.c.bf16 %v322_v28, %v321_v26  ;;  %v366_v26 = vld [vmem:[#allocation5 + $0x898] sm:$0xff] }
  0xac   :  { %1688 = vmatprep.subr.bf16.mxu1 %v1687_v39  ;;  %v1739_v39 = vpack.c.bf16 %v340_v32, %v339_v31  ;;  %v398_v28 = vld [vmem:[#allocation5 + $0x998] sm:$0xff]  ;;  %v85_v31 = vld [vmem:[#allocation3 + $0x70] sm:$0xff] }
  0xad   :  { %1658 = vmatpush3.bf16.msra.mxu0 %v1657_v45  ;;  %v1709_v45 = vpack.c.bf16 %v292_v37, %v291_v36  ;;  %v381_v36 = vld [vmem:[#allocation5 + $0x910] sm:$0xff] }
  0xae   :  { %1692 = vmatprep.subr.bf16.mxu0 %v1691_v47  ;;  %v1711_v47 = vpack.c.bf16 %v310_v42, %v309_v41  ;;  %v399_v41 = vld [vmem:[#allocation5 + $0x9a0] sm:$0xff]  ;;  %v400_v42 = vld [vmem:[#allocation5 + $0x9a8] sm:$0xff] }
  0xaf   :  { %1690 = vmatpush3.bf16.msra.mxu1 %v1689_v46  ;;  %v1741_v46 = vpack.c.bf16 %v324_v40, %v323_v38  ;;  %v382_v38 = vld [vmem:[#allocation5 + $0x918] sm:$0xff]  ;;  %v368_v40 = vld [vmem:[#allocation5 + $0x8a8] sm:$0xff] }
  0xb0   :  { %1724 = vmatprep.subr.bf16.mxu1 %v1723_v51  ;;  %763 = vmatmul.mubr.f32.vlgmr.msra.gmra.mrb[4].mxu0 %v79_v57  ;;  %v1743_v51 = vpack.c.bf16 %v342_v44, %v341_v43  ;;  %v1713_v57 = vpack.c.bf16 %v294_v49, %v293_v48  ;;  %v88_v43 = vld [vmem:[#allocation3 + $0x88] sm:$0xff]  ;;  %v351_v48 = vld [vmem:[#allocation5 + $0x820] sm:$0xff] }
  0xb1   :  { %1694 = vmatpush3.bf16.msra.mxu0 %v1693_v58  ;;  %902 = vmatprep.mubr.f32.mxu0 %v84_v7  ;;  %v1745_v58 = vpack.c.bf16 %v326_v52, %v325_v50  ;;  %v352_v49 = vld [vmem:[#allocation5 + $0x828] sm:$0xff]  ;;  %v383_v50 = vld [vmem:[#allocation5 + $0x920] sm:$0xff] }
  0xb2   :  { %833 = vmatmul.mubr.f32.vlgmr.msra.gmra.mrb[4].mxu1 %v81_v59  ;;  %1696 = vmatprep.subr.bf16.mxu0 %v1695_v61  ;;  %v1715_v59 = vpack.c.bf16 %v312_v54, %v311_v53  ;;  %v296_v61 = vld [vmem:[#allocation5 + $0x668] sm:$0xff]  ;;  %v369_v53 = vld [vmem:[#allocation5 + $0x8b0] sm:$0xff]  ;;  %v370_v54 = vld [vmem:[#allocation5 + $0x8b8] sm:$0xff] }
  0xb3   :  { %1726 = vmatpush3.bf16.msra.mxu1 %v1725_v60  ;;  %972 = vmatprep.mubr.f32.mxu1 %v86_v9  ;;  %v295_v60 = vld [vmem:[#allocation5 + $0x660] sm:$0xff]  ;;  %v298_v9 = vld [vmem:[#allocation5 + $0x678] sm:$0xff]  ;;  %v384_v52 = vld [vmem:[#allocation5 + $0x928] sm:$0xff] }
  0xb4   :  { %1728 = vmatprep.subr.bf16.mxu1 %v1727_v1  ;;  %v313_v1 = vld [vmem:[#allocation5 + $0x6f0] sm:$0xff]  ;;  %v1717_v5 = vpack.c.bf16 %v296_v61, %v295_v60  ;;  %v354_v61 = vld [vmem:[#allocation5 + $0x838] sm:$0xff] }
  0xb5   :  { %1698 = vmatpush3.bf16.msra.mxu0 %v1697_v8  ;;  %v1719_v7 = vpack.c.bf16 %v314_v2, %v313_v1  ;;  %v297_v8 = vld [vmem:[#allocation5 + $0x670] sm:$0xff]  ;;  %v371_v1 = vld [vmem:[#allocation5 + $0x8c0] sm:$0xff]  ;;  %v372_v2 = vld [vmem:[#allocation5 + $0x8c8] sm:$0xff] }
  0xb6   :  { %1700 = vmatprep.subr.bf16.mxu0 %v1699_v11  ;;  %v1751_v11 = vpack.c.bf16 %v346_v4, %v345_v3  ;;  %v1721_v17 = vpack.c.bf16 %v298_v9, %v297_v8  ;;  %v353_v60 = vld [vmem:[#allocation5 + $0x830] sm:$0xff]  ;;  %v403_v3 = vld [vmem:[#allocation5 + $0x9c0] sm:$0xff]  ;;  %v404_v4 = vld [vmem:[#allocation5 + $0x9c8] sm:$0xff] }
  0xb7   :  { %1730 = vmatpush3.bf16.msra.mxu1 %v1729_v10  ;;  %v329_v10 = vld [vmem:[#allocation5 + $0x770] sm:$0xff]  ;;  %v355_v8 = vld [vmem:[#allocation5 + $0x840] sm:$0xff]  ;;  %v356_v9 = vld [vmem:[#allocation5 + $0x848] sm:$0xff] }
  0xb8   :  { %1732 = vmatprep.subr.bf16.mxu1 %v1731_v15  ;;  %v395_v15 = vld [vmem:[#allocation5 + $0x980] sm:$0xff]  ;;  %v1753_v18 = vpack.c.bf16 %v330_v12, %v329_v10  ;;  %v388_v12 = vld [vmem:[#allocation5 + $0x948] sm:$0xff] }
  0xb9   :  { %1702 = vmatpush3.bf16.msra.mxu0 %v1701_v21  ;;  %v348_v21 = vld [vmem:[#allocation5 + $0x808] sm:$0xff]  ;;  %v387_v10 = vld [vmem:[#allocation5 + $0x940] sm:$0xff] }
  0xba   :  { %1704 = vmatprep.subr.bf16.mxu0 %v1703_v23  ;;  %v1787_v23 = vpack.c.bf16 %v396_v16, %v395_v15  ;;  %v1757_v30 = vpack.c.bf16 %v348_v21, %v347_v20  ;;  %v405_v15 = vld [vmem:[#allocation5 + $0x9d0] sm:$0xff]  ;;  %v406_v16 = vld [vmem:[#allocation5 + $0x9d8] sm:$0xff] }
  0xbb   :  { %1734 = vmatpush3.bf16.msra.mxu1 %v1733_v22  ;;  %v379_v22 = vld [vmem:[#allocation5 + $0x900] sm:$0xff]  ;;  %v357_v20 = vld [vmem:[#allocation5 + $0x850] sm:$0xff]  ;;  %v358_v21 = vld [vmem:[#allocation5 + $0x858] sm:$0xff] }
  0xbc   :  { %1736 = vmatprep.subr.bf16.mxu1 %v1735_v27  ;;  %v397_v27 = vld [vmem:[#allocation5 + $0x990] sm:$0xff]  ;;  %v1789_v32 = vpack.c.bf16 %v380_v24, %v379_v22  ;;  %v390_v24 = vld [vmem:[#allocation5 + $0x958] sm:$0xff] }
  0xbd   :  { %1706 = vmatpush3.bf16.msra.mxu0 %v1705_v33  ;;  %v1759_v33 = vpack.c.bf16 %v366_v26, %v365_v25  ;;  %v1791_v37 = vpack.c.bf16 %v398_v28, %v397_v27  ;;  %v389_v22 = vld [vmem:[#allocation5 + $0x950] sm:$0xff]  ;;  %v375_v25 = vld [vmem:[#allocation5 + $0x8e0] sm:$0xff]  ;;  %v376_v26 = vld [vmem:[#allocation5 + $0x8e8] sm:$0xff] }
  0xbe   :  { %1708 = vmatprep.subr.bf16.mxu0 %v1707_v35  ;;  %v350_v35 = vld [vmem:[#allocation5 + $0x818] sm:$0xff]  ;;  %v407_v27 = vld [vmem:[#allocation5 + $0x9e0] sm:$0xff]  ;;  %v408_v28 = vld [vmem:[#allocation5 + $0x9e8] sm:$0xff] }
  0xbf   :  { %1738 = vmatpush3.bf16.msra.mxu1 %v1737_v34  ;;  %v349_v34 = vld [vmem:[#allocation5 + $0x810] sm:$0xff] }
  0xc0   :  { %1740 = vmatprep.subr.bf16.mxu1 %v1739_v39  ;;  %v367_v39 = vld [vmem:[#allocation5 + $0x8a0] sm:$0xff]  ;;  %v1761_v44 = vpack.c.bf16 %v350_v35, %v349_v34  ;;  %v1811_v35 = vpack.c.bf16 %v408_v28, %v407_v27 }
  0xc1   :  { %1710 = vmatpush3.bf16.msra.mxu0 %v1709_v45  ;;  %v90_v45 = vld [vmem:[#allocation3 + $0x98] sm:$0xff]  ;;  %v391_v34 = vld [vmem:[#allocation5 + $0x960] sm:$0xff] }
  0xc2   :  { %1712 = vmatprep.subr.bf16.mxu0 %v1711_v47  ;;  %v1763_v47 = vpack.c.bf16 %v368_v40, %v367_v39  ;;  %v409_v39 = vld [vmem:[#allocation5 + $0x9f0] sm:$0xff]  ;;  %v410_v40 = vld [vmem:[#allocation5 + $0x9f8] sm:$0xff] }
  0xc3   :  { %1742 = vmatpush3.bf16.msra.mxu1 %v1741_v46  ;;  %v1793_v46 = vpack.c.bf16 %v382_v38, %v381_v36  ;;  %v392_v36 = vld [vmem:[#allocation5 + $0x968] sm:$0xff]  ;;  %v378_v38 = vld [vmem:[#allocation5 + $0x8f8] sm:$0xff] }
  0xc4   :  { %1744 = vmatprep.subr.bf16.mxu1 %v1743_v51  ;;  %v1795_v51 = vpack.c.bf16 %v400_v42, %v399_v41  ;;  %v1813_v42 = vpack.c.bf16 %v392_v36, %v391_v34 }
  0xc5   :  { %1714 = vmatpush3.bf16.msra.mxu0 %v1713_v57  ;;  %v1765_v57 = vpack.c.bf16 %v352_v49, %v351_v48  ;;  %v394_v48 = vld [vmem:[#allocation5 + $0x978] sm:$0xff] }
  0xc6   :  { %1716 = vmatprep.subr.bf16.mxu0 %v1715_v59  ;;  %v1767_v59 = vpack.c.bf16 %v370_v54, %v369_v53  ;;  %v1146_v54 = vld [vmem:[#allocation7] ss:$0 sm:$0xff] }
  0xc7   :  { %1746 = vmatpush3.bf16.msra.mxu1 %v1745_v58  ;;  %v1797_v58 = vpack.c.bf16 %v384_v52, %v383_v50  ;;  %v89_v52 = vld [vmem:[#allocation3 + $0x90] sm:$0xff] }
  0xc8   :  { %1748 = vmatprep.subr.bf16.mxu1 %v1747_v63  ;;  %v1799_v63 = vpack.c.bf16 %v402_v56, %v401_v55 }
  0xc9   :  { %1718 = vmatpush3.bf16.msra.mxu0 %v1717_v5  ;;  %v1769_v5 = vpack.c.bf16 %v354_v61, %v353_v60 }
  0xca   :  { %1720 = vmatprep.subr.bf16.mxu0 %v1719_v7  ;;  %v1771_v7 = vpack.c.bf16 %v372_v2, %v371_v1 }
  0xcb   :  { %1750 = vmatpush3.bf16.msra.mxu1 %v1749_v6  ;;  %v1801_v6 = vpack.c.bf16 %v386_v0, %v385_v62 }
  0xcc   :  { %1752 = vmatprep.subr.bf16.mxu1 %v1751_v11  ;;  %v1803_v11 = vpack.c.bf16 %v404_v4, %v403_v3 }
  0xcd   :  { %1722 = vmatpush3.bf16.msra.mxu0 %v1721_v17  ;;  %v1773_v17 = vpack.c.bf16 %v356_v9, %v355_v8 }
  0xce   :  { %1756 = vmatprep.subr.bf16.mxu0 %v1755_v19  ;;  %v1775_v19 = vpack.c.bf16 %v374_v14, %v373_v13 }
  0xcf   :  { %1754 = vmatpush3.bf16.msra.mxu1 %v1753_v18  ;;  %v1805_v18 = vpack.c.bf16 %v388_v12, %v387_v10 }
  0xd0   :  { %1788 = vmatprep.subr.bf16.mxu1 %v1787_v23  ;;  %903 = vmatmul.mubr.f32.vlgmr.msra.gmra.mrb[6].mxu0 %v83_v29  ;;  %v1807_v23 = vpack.c.bf16 %v406_v16, %v405_v15  ;;  %v1777_v29 = vpack.c.bf16 %v358_v21, %v357_v20 }
  0xd1   :  { %1758 = vmatpush3.bf16.msra.mxu0 %v1757_v30  ;;  %1042 = vmatprep.mubr.f32.mxu0 %v88_v43  ;;  %v1809_v30 = vpack.c.bf16 %v390_v24, %v389_v22 }
  0xd2   :  { %973 = vmatmul.mubr.f32.vlgmr.msra.gmra.mrb[6].mxu1 %v85_v31  ;;  %1760 = vmatprep.subr.bf16.mxu0 %v1759_v33  ;;  %v1779_v31 = vpack.c.bf16 %v376_v26, %v375_v25  ;;  %v360_v33 = vld [vmem:[#allocation5 + $0x868] sm:$0xff] }
  0xd3   :  { %1790 = vmatpush3.bf16.msra.mxu1 %v1789_v32  ;;  %1112 = vmatprep.mubr.f32.mxu1 %v90_v45  ;;  %v359_v32 = vld [vmem:[#allocation5 + $0x860] sm:$0xff]  ;;  %v362_v45 = vld [vmem:[#allocation5 + $0x878] sm:$0xff] }
  0xd4   :  { %1792 = vmatprep.subr.bf16.mxu1 %v1791_v37  ;;  %v377_v37 = vld [vmem:[#allocation5 + $0x8f0] sm:$0xff]  ;;  %v1781_v41 = vpack.c.bf16 %v360_v33, %v359_v32  ;;  %v1148_v33 = vld [vmem:[#allocation2] ss:$0 sm:$0xff] }
  0xd5   :  { %1762 = vmatpush3.bf16.msra.mxu0 %v1761_v44  ;;  %v1783_v43 = vpack.c.bf16 %v378_v38, %v377_v37  ;;  %v361_v44 = vld [vmem:[#allocation5 + $0x870] sm:$0xff] }
  0xd6   :  { %1764 = vmatprep.subr.bf16.mxu0 %v1763_v47  ;;  %v393_v47 = vld [vmem:[#allocation5 + $0x970] sm:$0xff]  ;;  %v1785_v49 = vpack.c.bf16 %v362_v45, %v361_v44 }
  0xd7   :  { %1794 = vmatpush3.bf16.msra.mxu1 %v1793_v46  ;;  %v1815_v46 = vpack.c.bf16 %v410_v40, %v409_v39  ;;  %v1817_v50 = vpack.c.bf16 %v394_v48, %v393_v47 }
  0xd8   :  { %1796 = vmatprep.subr.bf16.mxu1 %v1795_v51  ;;  %v87_v51 = vld [vmem:[#allocation3 + $0x80] sm:$0xff] }
  0xd9   :  { %1766 = vmatpush3.bf16.msra.mxu0 %v1765_v57 }
  0xda   :  { %1768 = vmatprep.subr.bf16.mxu0 %v1767_v59 }
  0xdb   :  { %1798 = vmatpush3.bf16.msra.mxu1 %v1797_v58 }
  0xdc   :  { %1800 = vmatprep.subr.bf16.mxu1 %v1799_v63 }
  0xdd   :  { %1770 = vmatpush3.bf16.msra.mxu0 %v1769_v5 }
  0xde   :  { %1772 = vmatprep.subr.bf16.mxu0 %v1771_v7 }
  0xdf   :  { %1802 = vmatpush3.bf16.msra.mxu1 %v1801_v6 }
  0xe0   :  { %1804 = vmatprep.subr.bf16.mxu1 %v1803_v11 }
  0xe1   :  { %1774 = vmatpush3.bf16.msra.mxu0 %v1773_v17 }
  0xe2   :  { %1776 = vmatprep.subr.bf16.mxu0 %v1775_v19 }
  0xe3   :  { %1806 = vmatpush3.bf16.msra.mxu1 %v1805_v18 }
  0xe4   :  { %1808 = vmatprep.subr.bf16.mxu1 %v1807_v23 }
  0xe5   :  { %1778 = vmatpush3.bf16.msra.mxu0 %v1777_v29 }
  0xe6   :  { %1780 = vmatprep.subr.bf16.mxu0 %v1779_v31 }
  0xe7   :  { %1810 = vmatpush3.bf16.msra.mxu1 %v1809_v30  ;;  %v1147_v30 = vld [vmem:[#allocation8] ss:$0 sm:$0xff] }
  0xe8   :  { %1812 = vmatprep.subr.bf16.mxu1 %v1811_v35 }
  0xe9   :  { %1782 = vmatpush3.bf16.msra.mxu0 %v1781_v41 }
  0xea   :  { %1784 = vmatprep.subr.bf16.mxu0 %v1783_v43 }
  0xeb   :  { %1814 = vmatpush3.bf16.msra.mxu1 %v1813_v42 }
  0xec   :  { %1816 = vmatprep.subr.bf16.mxu1 %v1815_v46 }
  0xed   :  { %1786 = vmatpush3.bf16.msra.mxu0 %v1785_v49 }
  0xef   :  { %1818 = vmatpush3.bf16.msra.mxu1 %v1817_v50 }
  0xf0   :  { %1043 = vmatmul.mubr.f32.vlgmr.msra.gmra.mrb[8].mxu0 %v87_v51 }
  0xf2   :  { %1113 = vmatmul.mubr.f32.vlgmr.msra.gmra.mrb[8].mxu1 %v89_v52 }
 0x143   :  { %v1181_v53 = vpop.f32.mrb[0].mxu0 }
 0x144   :  { %v1182_v55 = vpop.f32.mrb[1].mxu0 }
 0x145   :  { %v1216_v56 = vpop.f32.mrb[0].mxu1  ;;  %v1183_v57 = vadd.f32 %v1182_v55, %v1181_v53 }
 0x146   :  { %v1217_v58 = vpop.f32.mrb[1].mxu1 }
 0x147   :  { %v1218_v59 = vadd.f32 %v1217_v58, %v1216_v56  ;;  %v485_v60 = vadd.f32 %v1183_v57, %v1146_v54 }
 0x149   :  { %v555_v61 = vadd.f32 %v1218_v59, %v485_v60 }
 0x163   :  { %v1251_v62 = vpop.f32.mrb[2].mxu0 }
 0x164   :  { %v1252_v63 = vpop.f32.mrb[3].mxu0 }
 0x165   :  { %v1286_v0 = vpop.f32.mrb[2].mxu1  ;;  %v1253_v1 = vadd.f32 %v1252_v63, %v1251_v62 }
 0x166   :  { %v1287_v2 = vpop.f32.mrb[3].mxu1 }
 0x167   :  { %v1288_v3 = vadd.f32 %v1287_v2, %v1286_v0  ;;  %v625_v4 = vadd.f32 %v1253_v1, %v555_v61 }
 0x169   :  { %v695_v5 = vadd.f32 %v1288_v3, %v625_v4 }
 0x183   :  { %v1321_v6 = vpop.f32.mrb[4].mxu0 }
 0x184   :  { %v1322_v7 = vpop.f32.mrb[5].mxu0 }
 0x185   :  { %v1356_v8 = vpop.f32.mrb[4].mxu1  ;;  %v1323_v9 = vadd.f32 %v1322_v7, %v1321_v6 }
 0x186   :  { %v1357_v10 = vpop.f32.mrb[5].mxu1 }
 0x187   :  { %v1358_v11 = vadd.f32 %v1357_v10, %v1356_v8  ;;  %v765_v12 = vadd.f32 %v1323_v9, %v695_v5 }
 0x189   :  { %v835_v13 = vadd.f32 %v1358_v11, %v765_v12 }
 0x1a3   :  { %v1391_v14 = vpop.f32.mrb[6].mxu0 }
 0x1a4   :  { %v1392_v15 = vpop.f32.mrb[7].mxu0 }
 0x1a5   :  { %v1426_v16 = vpop.f32.mrb[6].mxu1  ;;  %v1393_v17 = vadd.f32 %v1392_v15, %v1391_v14 }
 0x1a6   :  { %v1427_v18 = vpop.f32.mrb[7].mxu1 }
 0x1a7   :  { %v1428_v19 = vadd.f32 %v1427_v18, %v1426_v16  ;;  %v905_v20 = vadd.f32 %v1393_v17, %v835_v13 }
 0x1a9   :  { %v975_v21 = vadd.f32 %v1428_v19, %v905_v20 }
 0x1c3   :  { %v1461_v22 = vpop.f32.mrb[8].mxu0 }
 0x1c4   :  { %v1462_v23 = vpop.f32.mrb[9].mxu0 }
 0x1c5   :  { %v1496_v24 = vpop.f32.mrb[8].mxu1  ;;  %v1463_v25 = vadd.f32 %v1462_v23, %v1461_v22 }
 0x1c6   :  { %v1497_v26 = vpop.f32.mrb[9].mxu1 }
 0x1c7   :  { %v1498_v27 = vadd.f32 %v1497_v26, %v1496_v24  ;;  %v1045_v28 = vadd.f32 %v1463_v25, %v975_v21 }
 0x1c9   :  { %v1115_v29 = vadd.f32 %v1498_v27, %v1045_v28 }
 0x1cb   :  { %v1118_v31 = vmax.f32 %v1115_v29, 0.0 }
 0x1cd   :  { %v1126_v32 = vmul.f32 %v1147_v30, %v1118_v31 }
 0x1cf   :  { %1127 = vadd.xlane.f32.xlu0 %v1126_v32 }
 0x25c   :  { %v1128_v34 = vpop.xlane.xlu0 %1127 }
 0x25d   :  { %v1136_v35 = vadd.f32 %v1148_v33, %v1128_v34 }
 0x25f   :  { %1138 = vst.msk [vmem:[%s2014_s5] sm:$0xff] %vm1137_vm0, %v1136_v35 }
 0x260   :  { %1143 = vsyncpa [#allocation4], 1 }
 0x261   :  { %1144 = vsyncpa [#allocation6], 1 }
 0x262   :  { %1145 = vsyncpa [#allocation9], 1 }

</bundles_post_ra>
